<compile_context>
chip_gen: v6e
topology: v6e:2x2x1
jax: 0.10.0
libtpu: 0.0.40
codegen_flags: <defaults>
</compile_context>

<pallas_src>
import jax
import jax.numpy as jnp
from jax import lax
from jax.experimental import pallas as pl
from jax.experimental.pallas import tpu as pltpu

LANE = 128


def dsvdd_kernel(x_ref, w_ref, const_ref, invd_ref, out_ref, score_ref):
    # projection: z = x @ W^T + b   (bf16 operands, f32 accumulation on the MXU)
    z = jnp.dot(x_ref[...], w_ref[...], preferred_element_type=jnp.float32)
    consts = const_ref[...]                 # (2, Dout_p) f32: row 0 = bias, row 1 = center
    z = z + consts[0:1, :]
    out_ref[...] = z.astype(out_ref.dtype)

    # DSVDD anomaly score, lane-packed: contract Dout on BOTH operands so per-sample
    # scores land in the lane axis -> one lane-dense (1, tb) row per grid step.
    #   score[m] = sum_j inv_denom[j] * (z[m, j] - c[j])^2
    diff = z - consts[1:2, :]
    score_ref[...] = lax.dot_general(
        invd_ref[...], diff * diff,
        dimension_numbers=(((1,), (1,)), ((), ())),
        preferred_element_type=jnp.float32,
    ).astype(score_ref.dtype)


def dsvdd_forward_and_scores(x, w_t, b, c, r, *, tb=512):
    """Fused projection + DSVDD anomaly score.

    Args:
      x:   [B, D_in] inputs
      w_t: [D_in, D_out] weight (PyTorch Linear weight, transposed)
      b:   [D_out] bias
      c:   [D_out] DSVDD center
      r:   [D_out] per-dimension radii R
      tb:  batch tile (rows per grid step); rounded to a lane multiple

    Returns:
      outputs [B, D_out] (the forward / projection output, f32), scores [B] (f32)
    """
    B, Din = x.shape
    Dout = w_t.shape[1]

    x = x.astype(jnp.float32)
    w_t = w_t.astype(jnp.float32)
    b = b.astype(jnp.float32)
    c = c.astype(jnp.float32)
    r = r.astype(jnp.float32)

    # --- pad contraction and output dims to lane multiples (lane-dense loads / MXU) ----
    Din_p = pl.cdiv(Din, LANE) * LANE
    Dout_p = pl.cdiv(Dout, LANE) * LANE
    if Din_p != Din:
        x = jnp.pad(x, ((0, 0), (0, Din_p - Din)))
        w_t = jnp.pad(w_t, ((0, Din_p - Din), (0, 0)))
    if Dout_p != Dout:
        pad = Dout_p - Dout
        w_t = jnp.pad(w_t, ((0, 0), (0, pad)))
        b = jnp.pad(b, (0, pad))
        c = jnp.pad(c, (0, pad))
        r = jnp.pad(r, (0, pad), constant_values=1.0)

    # constants hoisted out of the kernel: 1/(R^2 + eps), zeroed on padded columns so
    # padding never contaminates the score.
    inv_denom = 1.0 / (r * r + jnp.float32(1e-6))
    if Dout_p != Dout:
        inv_denom = jnp.where(jnp.arange(Dout_p) < Dout, inv_denom, 0.0)
    invd_row = inv_denom.reshape(1, Dout_p)                   # (1, Dout_p)
    consts = jnp.stack([b, c], axis=0)                        # (2, Dout_p)

    # --- batch tile: lane-multiple rows, >= 2 grid steps when possible (v7x megacore) ---
    tb = max(LANE, (tb // LANE) * LANE)
    tb = min(tb, pl.cdiv(B, LANE) * LANE)                     # don't pad far past B
    if B > LANE:
        tb = min(tb, pl.cdiv(pl.cdiv(B, 2), LANE) * LANE)     # keep at least 2 grid steps
    B_pad = pl.cdiv(B, tb) * tb
    n_tiles = B_pad // tb
    if B_pad != B:
        x = jnp.pad(x, ((0, B_pad - B), (0, 0)))

    # bf16 streamed operands: halves HBM read traffic and uses the native bf16 MXU path;
    # accumulation stays f32 inside the kernel (preferred_element_type).
    x_bf = x.astype(jnp.bfloat16)
    w_bf = w_t.astype(jnp.bfloat16)

    # TODO(synk): for very large Din the resident W^T should be tiled over an extra
    # "arbitrary" grid axis (pl.when-guarded accumulators) and vmem_limit_bytes set
    # explicitly (v5e default scoped VMEM is 16 MiB); unnecessary at these sizes.
    out_z, out_s = pl.pallas_call(
        dsvdd_kernel,
        out_shape=(
            jax.ShapeDtypeStruct((B_pad, Dout_p), jnp.float32),   # projection z
            jax.ShapeDtypeStruct((1, B_pad), jnp.float32),        # lane-packed scores
        ),
        grid_spec=pltpu.PrefetchScalarGridSpec(
            num_scalar_prefetch=0,
            grid=(n_tiles,),
            in_specs=[
                pl.BlockSpec((tb, Din_p), lambda i: (i, 0)),             # x tile (streamed)
                pl.BlockSpec((Din_p, Dout_p), lambda i: (0, 0),
                             pipeline_mode=pl.Buffered(1)),              # W^T resident, 1-buf
                pl.BlockSpec((2, Dout_p), lambda i: (0, 0),
                             pipeline_mode=pl.Buffered(1)),              # [bias; center]
                pl.BlockSpec((1, Dout_p), lambda i: (0, 0),
                             pipeline_mode=pl.Buffered(1)),              # inv_denom row
            ],
            out_specs=[
                pl.BlockSpec((tb, Dout_p), lambda i: (i, 0)),            # z tile
                pl.BlockSpec((1, tb), lambda i: (0, i)),                 # score row chunk
            ],
        ),
        compiler_params=pltpu.CompilerParams(
            dimension_semantics=("parallel",),
        ),
    )(x_bf, w_bf, consts, invd_row)

    outputs = out_z[:B, :Dout]
    scores = out_s[0, :B]
    return outputs, scores


def predict(scores, threshold_ratio=1.0):
    # plain-JAX glue, matches base_DSVDD.predict
    return (scores > threshold_ratio).astype(jnp.int32)


if __name__ == "__main__":
    # B=512 samples, D_in=256 features, D_out=96 projection dims (exercises Dout padding);
    # tb auto-caps to 256 -> 2 lane-dense, megacore-shardable grid steps.
    B, D_in, D_out = 512, 256, 96
    key = jax.random.PRNGKey(0)
    kx, kw, kb, kc = jax.random.split(key, 4)

    x = jax.random.normal(kx, (B, D_in), dtype=jnp.float32)

    # nn.Linear(D_in, D_out) default init: U(-1/sqrt(D_in), 1/sqrt(D_in))
    bound = 1.0 / jnp.sqrt(jnp.float32(D_in))
    w = jax.random.uniform(kw, (D_out, D_in), minval=-bound, maxval=bound,
                           dtype=jnp.float32)          # PyTorch layout [out, in]
    b = jax.random.uniform(kb, (D_out,), minval=-bound, maxval=bound,
                           dtype=jnp.float32)

    # R initialized to ones (as in __init__); c synthesized deterministically and clamped
    # away from zero exactly as initialize_center does.
    r = jnp.ones((D_out,), dtype=jnp.float32)
    c = 0.1 * jax.random.normal(kc, (D_out,), dtype=jnp.float32)
    c = jnp.where(jnp.abs(c) < 1e-6, jnp.float32(1e-6), c)

    w_t = w.T  # [D_in, D_out] for the kernel

    outputs, scores = dsvdd_forward_and_scores(x, w_t, b, c, r)
    outputs = jax.block_until_ready(outputs)
    scores = jax.block_until_ready(scores)

    # reference check (pure JAX) against the same bf16-rounded operands the kernel streams
    x_q = x.astype(jnp.bfloat16).astype(jnp.float32)
    w_q = w_t.astype(jnp.bfloat16).astype(jnp.float32)
    z_ref = x_q @ w_q + b[None, :]
    s_ref = jnp.sum((z_ref - c[None, :]) ** 2 / (r ** 2 + 1e-6), axis=1)

    assert outputs.shape == (B, D_out)
    assert scores.shape == (B,)
    assert jnp.allclose(outputs, z_ref, atol=5e-3, rtol=5e-3), \
        float(jnp.max(jnp.abs(outputs - z_ref)))
    assert jnp.allclose(scores, s_ref, atol=1e-1, rtol=2e-2), \
        float(jnp.max(jnp.abs(scores - s_ref)))

    _ = predict(scores)  # anomaly predictions (glue)

    print("KERNEL_OK")
</pallas_src>

<mosaic_0001>
module attributes {stable_mosaic.version = 11 : i64} {
  func.func @dsvdd_kernel(%arg0: i32, %arg1: memref<256x256xbf16, #tpu.memory_space<vmem>>, %arg2: memref<256x128xbf16, #tpu.memory_space<vmem>>, %arg3: memref<2x128xf32, #tpu.memory_space<vmem>>, %arg4: memref<1x128xf32, #tpu.memory_space<vmem>>, %arg5: memref<256x128xf32, #tpu.memory_space<vmem>>, %arg6: memref<1x256xf32, #tpu.memory_space<vmem>>) attributes {dimension_semantics = [#tpu.dimension_semantics<parallel>], iteration_bounds = array<i64: 2>, scalar_prefetch = 0 : i64, scratch_operands = 0 : i64, tpu.core_type = #tpu.core_type<tc>, window_params = [{transform_indices = @transform_0, window_bounds = array<i64: 256, 256>}, {pipeline_mode = #tpu.pipeline_mode<synchronous>, transform_indices = @transform_1, window_bounds = array<i64: 256, 128>}, {pipeline_mode = #tpu.pipeline_mode<synchronous>, transform_indices = @transform_2, window_bounds = array<i64: 2, 128>}, {pipeline_mode = #tpu.pipeline_mode<synchronous>, transform_indices = @transform_3, window_bounds = array<i64: 1, 128>}, {transform_indices = @transform_4, window_bounds = array<i64: 256, 128>}, {transform_indices = @transform_5, window_bounds = array<i64: 1, 256>}]} {
    %c0 = arith.constant 0 : index
    %c0_0 = arith.constant 0 : index
    %0 = vector.load %arg1[%c0, %c0_0] : memref<256x256xbf16, #tpu.memory_space<vmem>>, vector<256x256xbf16>
    %c0_1 = arith.constant 0 : index
    %c0_2 = arith.constant 0 : index
    %1 = vector.load %arg2[%c0_1, %c0_2] : memref<256x128xbf16, #tpu.memory_space<vmem>>, vector<256x128xbf16>
    %cst = arith.constant dense<0.000000e+00> : vector<256x128xf32>
    %2 = tpu.matmul %0, %1, %cst {dimension_numbers = #tpu.dot_dimension_numbers<[1], [0], [0], [1], [0, 0, 1, 1], [], []>} : vector<256x256xbf16>, vector<256x128xbf16>, vector<256x128xf32> -> vector<256x128xf32>
    %c0_3 = arith.constant 0 : index
    %c0_4 = arith.constant 0 : index
    %3 = vector.load %arg3[%c0_3, %c0_4] : memref<2x128xf32, #tpu.memory_space<vmem>>, vector<2x128xf32>
    %4 = vector.extract_strided_slice %3 {offsets = [0, 0], sizes = [1, 128], strides = [1, 1]} : vector<2x128xf32> to vector<1x128xf32>
    %5 = vector.broadcast %4 : vector<1x128xf32> to vector<256x128xf32>
    %6 = arith.addf %2, %5 : vector<256x128xf32>
    %c0_5 = arith.constant 0 : index
    %c0_6 = arith.constant 0 : index
    %7 = vector.load %arg5[%c0_5, %c0_6] : memref<256x128xf32, #tpu.memory_space<vmem>>, vector<256x128xf32>
    tpu.vector_store %arg5[%c0_5, %c0_6], %6 {strides = array<i32>} : memref<256x128xf32, #tpu.memory_space<vmem>>, vector<256x128xf32>,
    %8 = vector.extract_strided_slice %3 {offsets = [1, 0], sizes = [1, 128], strides = [1, 1]} : vector<2x128xf32> to vector<1x128xf32>
    %9 = vector.broadcast %8 : vector<1x128xf32> to vector<256x128xf32>
    %10 = arith.subf %6, %9 : vector<256x128xf32>
    %c0_7 = arith.constant 0 : index
    %c0_8 = arith.constant 0 : index
    %11 = vector.load %arg4[%c0_7, %c0_8] : memref<1x128xf32, #tpu.memory_space<vmem>>, vector<1x128xf32>
    %12 = arith.mulf %10, %10 : vector<256x128xf32>
    %cst_9 = arith.constant dense<0.000000e+00> : vector<1x256xf32>
    %13 = tpu.matmul %11, %12, %cst_9 {dimension_numbers = #tpu.dot_dimension_numbers<[1], [1], [0], [0], [0, 0, 1, 0], [], []>} : vector<1x128xf32>, vector<256x128xf32>, vector<1x256xf32> -> vector<1x256xf32>
    %c0_10 = arith.constant 0 : index
    %c0_11 = arith.constant 0 : index
    %14 = vector.load %arg6[%c0_10, %c0_11] : memref<1x256xf32, #tpu.memory_space<vmem>>, vector<1x256xf32>
    tpu.vector_store %arg6[%c0_10, %c0_11], %13 {strides = array<i32>} : memref<1x256xf32, #tpu.memory_space<vmem>>, vector<1x256xf32>,
    return
  }
  func.func @transform_0(%arg0: i32) -> (i32, i32) {
    %c0_i32 = arith.constant 0 : i32
    %c0_i32_0 = arith.constant 0 : i32
    return %arg0, %c0_i32 : i32, i32
  }
  func.func @transform_1(%arg0: i32) -> (i32, i32) {
    %c0_i32 = arith.constant 0 : i32
    %c0_i32_0 = arith.constant 0 : i32
    %c0_i32_1 = arith.constant 0 : i32
    return %c0_i32, %c0_i32_0 : i32, i32
  }
  func.func @transform_2(%arg0: i32) -> (i32, i32) {
    %c0_i32 = arith.constant 0 : i32
    %c0_i32_0 = arith.constant 0 : i32
    %c0_i32_1 = arith.constant 0 : i32
    return %c0_i32, %c0_i32_0 : i32, i32
  }
  func.func @transform_3(%arg0: i32) -> (i32, i32) {
    %c0_i32 = arith.constant 0 : i32
    %c0_i32_0 = arith.constant 0 : i32
    %c0_i32_1 = arith.constant 0 : i32
    return %c0_i32, %c0_i32_0 : i32, i32
  }
  func.func @transform_4(%arg0: i32) -> (i32, i32) {
    %c0_i32 = arith.constant 0 : i32
    %c0_i32_0 = arith.constant 0 : i32
    return %arg0, %c0_i32 : i32, i32
  }
  func.func @transform_5(%arg0: i32) -> (i32, i32) {
    %c0_i32 = arith.constant 0 : i32
    %c0_i32_0 = arith.constant 0 : i32
    return %c0_i32, %arg0 : i32, i32
  }
}

</mosaic_0001>

<bundles_post_ra>
// kernel: tpu_custom_call.1
= control target key start
LH: loop header
LB: loop body
LE: loop exit
PB: predicated region body
PF: predicated region fallthrough
CT: control target
= control target key end

     0   :  { %11 = vsyncpa [#allocation3], 0  ;;  %s2119_s0 = inlined_call_operand.hbm [shape: bf16[512,256], index: 0, kind: input, shape index: {}]   ;;  %s2120_s1 = inlined_call_operand.hbm [shape: bf16[256,128], index: 1, kind: input, shape index: {}]   ;;  %s2121_s2 = inlined_call_operand.vmem [shape: f32[2,128], index: 2, kind: input, shape index: {}]   ;;  %s2122_s3 = inlined_call_operand.vmem [shape: f32[1,128], index: 3, kind: input, shape index: {}]   ;;  %s2123_s4 = inlined_call_operand.hbm [shape: f32[512,128], index: 4, kind: output, shape index: {0}]   ;;  %s2124_s5 = inlined_call_operand.hbm [shape: f32[1,512], index: 5, kind: output, shape index: {1}]  }
   0x1   :  { %13 = vsyncpa [#allocation3 + $0x1], 0 }
   0x2   :  { %14 = vsyncpa [#allocation6], 0 }
   0x3   :  { %15 = vsyncpa [#allocation4], 0 }
   0x4   :  { %17 = vsyncpa [#allocation4 + $0x1], 0 }
   0x5   :  { %18 = vsyncpa [#allocation9], 0 }
   0x6   :  { %20 = vsyncpa [#allocation9 + $0x1], 0  ;;  %s1666_s18 = smov 0   ;;  %s1668_s19 = smov 0  }
   0x7   :  { %s1670_s20 = smov 0   ;;  %s1672_s21 = smov 0  }
   0x8 LB: > { %s1687_s22 = sadd.s32 4294967295, %s1623_s21   ;;  %s1103_s23 = sadd.s32 4294967294, %s1623_s21   ;;  %s1623_s21 = sphi %s1672_s21, %s2146_s21   ;;  %s1619_s20 = sphi %s1670_s20, %s2145_s20   ;;  %s1615_s19 = sphi %s1668_s19, %s2144_s19   ;;  %s1611_s18 = sphi %s1666_s18, %s2143_s18  }
   0x9   : > { %p46_p0 = scmp.ne.s32.totalorder %s1615_s19, %s1611_s18  ;;  %p2125_p1 = scmp.eq.s32.totalorder %s1687_s22, 0 }
   0xa   : > { %p139_p3 = scmp.eq.s32.totalorder %s1103_s23, 1  ;;  %p1104_p5 = scmp.ge.s32.totalorder %s1623_s21, 1 }
   0xb   : > { %p1696_p4 = por %p2125_p1, %p46_p0  ;;  %p172_p7 = scmp.lt.s32.totalorder %s1623_s21, 3 }
   0xc   : > { %p1701_p6 = por %p139_p3, %p46_p0  ;;  %s1625_s27 = smov [#allocation5]  }
   0xd   : > { %s2129_s24 = scalar_select %p1696_p4, 1, 0 }
   0xe   : > { %s2130_s25 = scalar_select %p1701_p6, 1, 0 }
   0xf   : > { %p1706_p8 = pnand %p1104_p5, %p172_p7  ;;  %s184_s28 = sshll.u32 %s1625_s27, 4  ;;  %s185_s28 = int_to_ptr.vmem [resolvable:$true] %s184_s28 }
  0x10   : > { %s1720_s30 = sadd.s32 1, %s1623_s21   ;;  %s33_s6 = sadd.s32 1, %s1619_s20 }
  0x11   : > { %s2131_s26 = scalar_select %p1706_p8, 1, 0 }
  0x12   : > { %p1348_p9 = pneg %p1706_p8  ;;  %s30_s7 = ssub.s32 %s1623_s21, %s1720_s30 }
  0x13   : > { %s1482_s8 = scalar_lea.vmem %s185_s28, 2048  ;;  %p1490_p5 = scmp.lt.s32.totalorder %s185_s28, %s185_s28 }
  0x14   : > { %p1715_p11 = pnand %p1348_p9, %p2125_p1  ;;  %p1483_p13 = scmp.ne.s32.totalorder %s185_s28, %s1482_s8 }
  0x15   : > { %p1491_p7 = scmp.lt.s32.totalorder %s1482_s8, %s1482_s8 }
  0x16   : > { %p1473_p12 = pneg %p1715_p11 }
  0x17   : > { %p1492_p10 = por %p1491_p7, %p1490_p5 }
  0x18   : > { %p1485_p0 = pnand %p1483_p13, %p1473_p12 }
  0x1a   : > { %p1486_p3 = pneg %p1485_p0 }
  0x1c   : > { %p1493_p2 = pnand %p1492_p10, %p1486_p3 }
  0x1e   : > { %1496 = shalt.err (!%p1493_p2)
}
  0x1f   : > { %s1626_s9 = smov 64   ;;  %s1627_s10 = smov 4  }
  0x20   : > { %1351 = dma.hbm_to_vmem [thread:$0]  (!%p1715_p11), %s2120_s1, 2048, %s185_s28, [#allocation6], %s1626_s9, %s1626_s9, %s1627_s10  }
  0x21   : > { %p31_p9 = scmp.eq.s32.totalorder %s30_s7, 0  ;;  %p40_p12 = scmp.ne.s32.totalorder %s1619_s20, %s1615_s19 }
  0x22   : > { %p41_p10 = scmp.eq.s32.totalorder %s1623_s21, 0  ;;  %p1364_p2 = scmp.lt.s32.totalorder %s1623_s21, 2 }
  0x23   : > { %s1737_s13 = scalar_select %p31_p9, %s1619_s20, %s33_s6  }
  0x24   : > { %p42_p13 = por %p41_p10, %p40_p12  ;;  %p2133_p0 = scmp.eq.s32.totalorder %s1687_s22, 1 }
  0x25   : > { %s204_s15 = sand.u32 1, %s1619_s20   ;;  %s1173_s16 = sshll.u32 %s1623_s21, 12 }
  0x26   : > { %p1741_p3 = por %p2133_p0, %p40_p12  ;;  %s1107_s17 = sshll.u32 %s204_s15, 8 }
  0x27   : > { %s1750_s29 = scalar_lea.hbm %s2119_s0, %s1173_s16  ;;  %s208_s28 = scalar_lea.vmem [#allocation2], %s1107_s17 }
  0x28   : > { %s2134_s14 = scalar_select %p1741_p3, 1, 0 }
  0x29   : > { %s216_s6 = sshll.u32 %s208_s28, 4  ;;  %p1752_p11 = pnand %p1364_p2, %p42_p13  ;;  %s1756_s6 = int_to_ptr.vmem [resolvable:$true] %s216_s6 }
  0x2a   : > { %s1758_s8 = scalar_lea.sflag [#allocation3], %s204_s15  ;;  %s1497_s9 = scalar_lea.hbm %s1750_s29, 4096 }
  0x2b   : > { %p1498_p5 = scmp.ne.s32.totalorder %s1750_s29, %s1497_s9  ;;  %p1499_p7 = pneg %p1752_p11 }
  0x2c   : > { %s1502_s12 = scalar_lea.hbm %s2119_s0, 8192  ;;  %p1503_p10 = scmp.lt.s32.totalorder %s1750_s29, %s2119_s0 }
  0x2d   : > { %p1500_p9 = pnand %p1499_p7, %p1498_p5  ;;  %p1504_p2 = scmp.lt.s32.totalorder %s1502_s12, %s1497_s9 }
  0x2f   : > { %p1501_p12 = pneg %p1500_p9  ;;  %p1505_p13 = por %p1504_p2, %p1503_p10 }
  0x31   : > { %p1506_p0 = pnand %p1505_p13, %p1501_p12 }
  0x33   : > { %1509 = shalt.err (!%p1506_p0)
}
  0x34   : > { %s1510_s15 = scalar_lea.vmem %s1756_s6, 4096  ;;  %s1628_s23 = smov [#allocation2]  }
  0x35   : > { %p1511_p1 = scmp.ne.s32.totalorder %s1756_s6, %s1510_s15  ;;  %s1515_s27 = sshll.u32 %s1628_s23, 4  ;;  %s1516_s27 = int_to_ptr.vmem [resolvable:$false] %s1515_s27 }
  0x36   : > { %s1517_s28 = scalar_lea.vmem %s1516_s27, 8192  ;;  %p1518_p9 = scmp.lt.s32.totalorder %s1756_s6, %s1516_s27 }
  0x37   : > { %p1513_p6 = pnand %p1511_p1, %p1499_p7  ;;  %p1519_p3 = scmp.lt.s32.totalorder %s1517_s28, %s1510_s15 }
  0x39   : > { %p1514_p5 = pneg %p1513_p6  ;;  %p1520_p4 = por %p1519_p3, %p1518_p9 }
  0x3b   : > { %p1521_p8 = pnand %p1520_p4, %p1514_p5 }
  0x3d   : > { %1524 = shalt.err (!%p1521_p8)
}
  0x3e   : > { %s1629_s9 = smov 128   ;;  %s1630_s10 = smov 8  }
  0x3f   : > { %1355 = dma.hbm_to_vmem [thread:$0]  (!%p1752_p11), %s1750_s29, 4096, %s1756_s6, %s1758_s8, %s1629_s9, %s1629_s9, %s1630_s10  }
  0x40   : > { %p2136_p1 = scmp.ne.s32.totalorder %s2131_s26, 0 }
  0x41   : > { %s1782_s11 = sand.u32 (!%p2136_p1), 1, %s1615_s19   ;;  %p2137_p4 = scmp.ne.s32.totalorder (!%p2136_p1), %s2129_s24, 0 }
  0x42   : > { %228 = sbr.rel (%p2136_p1) target bundleno = 649 (0x289), region = 36  ;;  %s1112_s12 = sshll.u32 (!%p2136_p1), %s1782_s11, 8 }
  0x43   : > { %s231_s16 = scalar_lea.sflag (!%p2136_p1), [#allocation3], %s1782_s11  ;;  %s1788_s17 = scalar_lea.vmem (!%p2136_p1), [#allocation2], %s1112_s12 }
  0x47   : > { %1594 = dma.done.wait (%p2137_p4), %s231_s16, 4096  }
  0x48   : > { %1596 = vsyncadd (%p2137_p4), %s231_s16, 4294963200  ;;  %p2138_p6 = scmp.eq.s32.totalorder %s1687_s22, 0 }
  0x4a   : > { %1598 = dma.done.wait (%p2138_p6), [#allocation6], 2048   ;;  %p2139_p8 = pmov %p2138_p6 }
  0x4b   : > { %v1407_v0 = vld [vmem:[#allocation5 + $0x78] sm:$0xff]   ;;  %v1409_v2 = vld [vmem:[#allocation5 + $0x70] sm:$0xff]   ;;  %v1411_v4 = vld [vmem:[#allocation5 + $0x68] sm:$0xff]   ;;  %v339_v48 = vlaneseq  ;;  %s1856_s7 = scalar_lea.vmem [#allocation7], %s1112_s12  ;;  %s1174_s8 = sshll.u32 %s1687_s22, 12 }
  0x4c   : > { %1600 = vsyncadd (%p2139_p8), [#allocation6], 4294965248  ;;  %v1408_v1 = vld [vmem:[#allocation5 + $0x38] sm:$0xff]   ;;  %1176 = vmatprep.subr.bf16.mxu0 %v1407_v0  ;;  %1322 = vmatprep.subr.bf16.mxu1 %v1407_v0  ;;  %v1410_v3 = vld [vmem:[#allocation5 + $0x30] sm:$0xff]   ;;  %s2053_s27 = scalar_lea.hbm %s2123_s4, %s1174_s8  ;;  %s974_s28 = sshll.u32 %s1856_s7, 4  ;;  %s2056_s28 = int_to_ptr.vmem [resolvable:$true] %s974_s28 }
  0x4d   : > { %1177 = vmatpush3.bf16.msra.mxu0 %v1408_v1  ;;  %1330 = vmatpush3.bf16.msra.mxu1 %v1408_v1  ;;  %v1412_v5 = vld [vmem:[#allocation5 + $0x28] sm:$0xff]   ;;  %v1413_v6 = vld [vmem:[#allocation5 + $0x60] sm:$0xff]   ;;  %v1415_v8 = vld [vmem:[#allocation5 + $0x58] sm:$0xff]   ;;  %v1831_v49 = vshrl.u32 %v339_v48, 7  ;;  %s956_s9 = scalar_lea.sflag [#allocation4], %s1782_s11  ;;  %s1525_s10 = scalar_lea.vmem %s2056_s28, 4096 }
  0x4e   : > { %1178 = vmatprep.subr.bf16.mxu0 %v1409_v2  ;;  %1323 = vmatprep.subr.bf16.mxu1 %v1409_v2  ;;  %v1414_v7 = vld [vmem:[#allocation5 + $0x20] sm:$0xff]   ;;  %v1416_v9 = vld [vmem:[#allocation5 + $0x18] sm:$0xff]   ;;  %v1417_v10 = vld [vmem:[#allocation5 + $0x50] sm:$0xff]   ;;  %p1526_p3 = scmp.ne.s32.totalorder %s2056_s28, %s1525_s10  ;;  %p2140_p11 = scmp.ne.s32.totalorder %s2134_s14, 0 }
  0x4f   : > { %v1425_v11 = vld [vmem:[%s1788_s17 + $0x4] ss:$8 sps:$4 sm:$0xff]   ;;  %v1418_v13 = vld [vmem:[#allocation5 + $0x10] sm:$0xff]   ;;  %v1423_v18 = vld [vmem:[%s1788_s17] ss:$8 sps:$4 sm:$0xff]   ;;  %v341_v50 = vsub.s32 0, %v1831_v49 }
  0x50   : > { %v1428_v12 = vld [vmem:[%s1788_s17 + $0x84] ss:$8 sps:$4 sm:$0xff]   ;;  %631 = vmatprep.mubr.bf16.mxu0 %v1425_v11  ;;  %v1426_v19 = vld [vmem:[%s1788_s17 + $0x80] ss:$8 sps:$4 sm:$0xff]   ;;  %v1429_v20 = vld [vmem:[%s1788_s17 + $0x14] ss:$8 sps:$4 sm:$0xff]   ;;  %p1527_p7 = pnand %p1526_p3, %p2140_p11 }
  0x51   : > { %1179 = vmatpush3.bf16.msra.mxu0 %v1410_v3  ;;  %1331 = vmatpush3.bf16.msra.mxu1 %v1410_v3  ;;  %v1419_v14 = vld [vmem:[#allocation5 + $0x48] sm:$0xff]   ;;  %v1421_v16 = vld [vmem:[#allocation5 + $0x40] sm:$0xff]   ;;  %v1431_v21 = vld [vmem:[%s1788_s17 + $0x94] ss:$8 sps:$4 sm:$0xff]   ;;  %s1631_s12 = smov [#allocation7]  }
  0x52   : > { %1180 = vmatprep.subr.bf16.mxu0 %v1411_v4  ;;  %1324 = vmatprep.subr.bf16.mxu1 %v1411_v4  ;;  %v1420_v15 = vld [vmem:[#allocation5 + $0x8] sm:$0xff]   ;;  %v1422_v17 = vld [vmem:[#allocation5] sm:$0xff]   ;;  %v1433_v22 = vld [vmem:[%s1788_s17 + $0x10] ss:$8 sps:$4 sm:$0xff]   ;;  %p1528_p12 = pneg %p1527_p7  ;;  %s1529_s16 = sshll.u32 %s1631_s12, 4  ;;  %s1530_s16 = int_to_ptr.vmem [resolvable:$false] %s1529_s16 }
  0x53   : > { %695 = vmatprep.mubr.bf16.mxu1 %v1428_v12  ;;  %v1434_v23 = vld [vmem:[%s1788_s17 + $0x90] ss:$8 sps:$4 sm:$0xff]   ;;  %v1435_v24 = vld [vmem:[%s1788_s17 + $0x24] ss:$8 sps:$4 sm:$0xff]   ;;  %v1439_v26 = vld [vmem:[%s1788_s17 + $0x20] ss:$8 sps:$4 sm:$0xff]   ;;  %p1532_p10 = scmp.lt.s32.totalorder %s2056_s28, %s1530_s16 }
  0x54   : > { %v1437_v25 = vld [vmem:[%s1788_s17 + $0xa4] ss:$8 sps:$4 sm:$0xff]   ;;  %v1440_v27 = vld [vmem:[%s1788_s17 + $0xa0] ss:$8 sps:$4 sm:$0xff]   ;;  %v1441_v28 = vld [vmem:[%s1788_s17 + $0x34] ss:$8 sps:$4 sm:$0xff]  }
  0x55   : > { %1181 = vmatpush3.bf16.msra.mxu0 %v1412_v5  ;;  %1332 = vmatpush3.bf16.msra.mxu1 %v1412_v5  ;;  %v1443_v29 = vld [vmem:[%s1788_s17 + $0xb4] ss:$8 sps:$4 sm:$0xff]   ;;  %v1445_v30 = vld [vmem:[%s1788_s17 + $0x30] ss:$8 sps:$4 sm:$0xff]   ;;  %v1447_v32 = vld [vmem:[%s1788_s17 + $0x44] ss:$8 sps:$4 sm:$0xff]  }
  0x56   : > { %1182 = vmatprep.subr.bf16.mxu0 %v1413_v6  ;;  %1325 = vmatprep.subr.bf16.mxu1 %v1413_v6  ;;  %v1446_v31 = vld [vmem:[%s1788_s17 + $0xb0] ss:$8 sps:$4 sm:$0xff]   ;;  %v1449_v33 = vld [vmem:[%s1788_s17 + $0xc4] ss:$8 sps:$4 sm:$0xff]   ;;  %v1451_v34 = vld [vmem:[%s1788_s17 + $0x40] ss:$8 sps:$4 sm:$0xff]  }
  0x57   : > { %v1452_v35 = vld [vmem:[%s1788_s17 + $0xc0] ss:$8 sps:$4 sm:$0xff]   ;;  %v1453_v36 = vld [vmem:[%s1788_s17 + $0x54] ss:$8 sps:$4 sm:$0xff]   ;;  %v1457_v38 = vld [vmem:[%s1788_s17 + $0x50] ss:$8 sps:$4 sm:$0xff]  }
  0x58   : > { %v1455_v37 = vld [vmem:[%s1788_s17 + $0xd4] ss:$8 sps:$4 sm:$0xff]   ;;  %v1458_v39 = vld [vmem:[%s1788_s17 + $0xd0] ss:$8 sps:$4 sm:$0xff]   ;;  %v1459_v40 = vld [vmem:[%s1788_s17 + $0x64] ss:$8 sps:$4 sm:$0xff]  }
  0x59   : > { %1183 = vmatpush3.bf16.msra.mxu0 %v1414_v7  ;;  %1333 = vmatpush3.bf16.msra.mxu1 %v1414_v7  ;;  %v1461_v41 = vld [vmem:[%s1788_s17 + $0xe4] ss:$8 sps:$4 sm:$0xff]   ;;  %v1463_v42 = vld [vmem:[%s1788_s17 + $0x60] ss:$8 sps:$4 sm:$0xff]   ;;  %v1465_v44 = vld [vmem:[%s1788_s17 + $0x74] ss:$8 sps:$4 sm:$0xff]  }
  0x5a   : > { %1184 = vmatprep.subr.bf16.mxu0 %v1415_v8  ;;  %1326 = vmatprep.subr.bf16.mxu1 %v1415_v8  ;;  %v1464_v43 = vld [vmem:[%s1788_s17 + $0xe0] ss:$8 sps:$4 sm:$0xff]   ;;  %v1467_v45 = vld [vmem:[%s1788_s17 + $0xf4] ss:$8 sps:$4 sm:$0xff]   ;;  %v1469_v46 = vld [vmem:[%s1788_s17 + $0x70] ss:$8 sps:$4 sm:$0xff]  }
  0x5b   : > { %v1470_v47 = vld [vmem:[%s1788_s17 + $0xf0] ss:$8 sps:$4 sm:$0xff]   ;;  %v1837_v51 = vld [vmem:[%s2121_s2] sm:$0x3]  ;;  %s1531_s17 = scalar_lea.vmem %s1530_s16, 8192 }
  0x5c   : > { %v1840_v54 = vrot.slane %v1837_v51, %v341_v50  ;;  %v1845_v61 = vld [vmem:[%s2122_s3] sm:$0x1]  ;;  %p1533_p2 = scmp.lt.s32.totalorder %s1531_s17, %s1525_s10 }
  0x5d   : > { %1185 = vmatpush3.bf16.msra.mxu0 %v1416_v9  ;;  %1334 = vmatpush3.bf16.msra.mxu1 %v1416_v9 }
  0x5e   : > { %1186 = vmatprep.subr.bf16.mxu0 %v1417_v10  ;;  %1327 = vmatprep.subr.bf16.mxu1 %v1417_v10  ;;  %p1534_p13 = por %p1533_p2, %p1532_p10 }
  0x60   : > { %p1535_p0 = pnand %p1534_p13, %p1528_p12 }
  0x61   : > { %1187 = vmatpush3.bf16.msra.mxu0 %v1418_v13  ;;  %1335 = vmatpush3.bf16.msra.mxu1 %v1418_v13 }
  0x62   : > { %1188 = vmatprep.subr.bf16.mxu0 %v1419_v14  ;;  %1328 = vmatprep.subr.bf16.mxu1 %v1419_v14 }
  0x65   : > { %1189 = vmatpush3.bf16.msra.mxu0 %v1420_v15  ;;  %1336 = vmatpush3.bf16.msra.mxu1 %v1420_v15 }
  0x66   : > { %1190 = vmatprep.subr.bf16.mxu0 %v1421_v16  ;;  %1329 = vmatprep.subr.bf16.mxu1 %v1421_v16 }
  0x69   : > { %1191 = vmatpush3.bf16.msra.mxu0 %v1422_v17  ;;  %1337 = vmatpush3.bf16.msra.mxu1 %v1422_v17 }
  0x6c   : > { %632 = vmatmul.mubr.bf16.vlgmr.msra.gmra.mxu0 %v1423_v18  ;;  %696 = vmatmul.mubr.bf16.vlgmr.msra.gmra.mxu1 %v1426_v19 }
  0x6d   : > { %639 = vmatprep.mubr.bf16.mxu0 %v1429_v20  ;;  %703 = vmatprep.mubr.bf16.mxu1 %v1431_v21 }
  0x74   : > { %640 = vmatmul.mubr.bf16.gmra.mxu0 %v1433_v22  ;;  %704 = vmatmul.mubr.bf16.gmra.mxu1 %v1434_v23 }
  0x75   : > { %647 = vmatprep.mubr.bf16.mxu0 %v1435_v24  ;;  %711 = vmatprep.mubr.bf16.mxu1 %v1437_v25 }
  0x7c   : > { %648 = vmatmul.mubr.bf16.gmra.mxu0 %v1439_v26  ;;  %712 = vmatmul.mubr.bf16.gmra.mxu1 %v1440_v27 }
  0x7d   : > { %655 = vmatprep.mubr.bf16.mxu0 %v1441_v28  ;;  %719 = vmatprep.mubr.bf16.mxu1 %v1443_v29 }
  0x84   : > { %656 = vmatmul.mubr.bf16.gmra.mxu0 %v1445_v30  ;;  %720 = vmatmul.mubr.bf16.gmra.mxu1 %v1446_v31 }
  0x85   : > { %663 = vmatprep.mubr.bf16.mxu0 %v1447_v32  ;;  %727 = vmatprep.mubr.bf16.mxu1 %v1449_v33 }
  0x8c   : > { %664 = vmatmul.mubr.bf16.gmra.mxu0 %v1451_v34  ;;  %728 = vmatmul.mubr.bf16.gmra.mxu1 %v1452_v35 }
  0x8d   : > { %671 = vmatprep.mubr.bf16.mxu0 %v1453_v36  ;;  %735 = vmatprep.mubr.bf16.mxu1 %v1455_v37 }
  0x94   : > { %672 = vmatmul.mubr.bf16.gmra.mxu0 %v1457_v38  ;;  %736 = vmatmul.mubr.bf16.gmra.mxu1 %v1458_v39 }
  0x95   : > { %679 = vmatprep.mubr.bf16.mxu0 %v1459_v40  ;;  %743 = vmatprep.mubr.bf16.mxu1 %v1461_v41 }
  0x9c   : > { %680 = vmatmul.mubr.bf16.gmra.mxu0 %v1463_v42  ;;  %744 = vmatmul.mubr.bf16.gmra.mxu1 %v1464_v43 }
  0x9d   : > { %687 = vmatprep.mubr.bf16.mxu0 %v1465_v44  ;;  %751 = vmatprep.mubr.bf16.mxu1 %v1467_v45 }
  0xa4   : > { %688 = vmatmul.mubr.bf16.gmra.mxu0 %v1469_v46  ;;  %752 = vmatmul.mubr.bf16.gmra.mxu1 %v1470_v47 }
  0xa5   : > { %1320 = vmatprep.mubr.f32.mxu1 %v1845_v61 }
 0x12c   : > { %v1192_v52 = vpop.f32.mrf.mxu0  ;;  %v1240_v53 = vpop.f32.mrf.mxu1 }
 0x12e   : > { %v1193_v55 = vpop.f32.mrf.mxu0  ;;  %v1241_v56 = vpop.f32.mrf.mxu1 }
 0x12f   : > { %v1194_v57 = vadd.f32 %v1193_v55, %v1192_v52  ;;  %v1242_v58 = vadd.f32 %v1241_v56, %v1240_v53 }
 0x130   : > { %v1195_v59 = vpop.f32.mrf.mxu0  ;;  %v1243_v60 = vpop.f32.mrf.mxu1 }
 0x131   : > { %v1848_v62 = vadd.f32 %v1194_v57, %v1840_v54  ;;  %v1851_v63 = vadd.f32 %v1242_v58, %v1840_v54 }
 0x132   : > { %v1196_v0 = vpop.f32.mrf.mxu0  ;;  %v1244_v1 = vpop.f32.mrf.mxu1 }
 0x133   : > { %760 = vst [vmem:[%s1856_s7] sm:$0xff] %v1848_v62  ;;  %776 = vst [vmem:[%s1856_s7 + $0x80] sm:$0xff] %v1851_v63  ;;  %v1197_v2 = vadd.f32 %v1196_v0, %v1195_v59  ;;  %v1245_v3 = vadd.f32 %v1244_v1, %v1243_v60 }
 0x134   : > { %v1198_v4 = vpop.f32.mrf.mxu0  ;;  %v1246_v5 = vpop.f32.mrf.mxu1 }
 0x135   : > { %v1863_v6 = vadd.f32 %v1197_v2, %v1840_v54  ;;  %v1866_v7 = vadd.f32 %v1245_v3, %v1840_v54 }
 0x136   : > { %v1199_v8 = vpop.f32.mrf.mxu0  ;;  %v1247_v9 = vpop.f32.mrf.mxu1 }
 0x137   : > { %761 = vst [vmem:[%s1856_s7 + $0x8] sm:$0xff] %v1863_v6  ;;  %777 = vst [vmem:[%s1856_s7 + $0x88] sm:$0xff] %v1866_v7  ;;  %v1200_v10 = vadd.f32 %v1199_v8, %v1198_v4  ;;  %v1248_v11 = vadd.f32 %v1247_v9, %v1246_v5 }
 0x138   : > { %v1201_v12 = vpop.f32.mrf.mxu0  ;;  %v1249_v13 = vpop.f32.mrf.mxu1 }
 0x139   : > { %v1873_v14 = vadd.f32 %v1200_v10, %v1840_v54  ;;  %v1876_v15 = vadd.f32 %v1248_v11, %v1840_v54 }
 0x13a   : > { %v1202_v16 = vpop.f32.mrf.mxu0  ;;  %v1250_v17 = vpop.f32.mrf.mxu1 }
 0x13b   : > { %762 = vst [vmem:[%s1856_s7 + $0x10] sm:$0xff] %v1873_v14  ;;  %778 = vst [vmem:[%s1856_s7 + $0x90] sm:$0xff] %v1876_v15  ;;  %v1203_v18 = vadd.f32 %v1202_v16, %v1201_v12  ;;  %v1251_v19 = vadd.f32 %v1250_v17, %v1249_v13 }
 0x13c   : > { %v1204_v20 = vpop.f32.mrf.mxu0  ;;  %v1252_v21 = vpop.f32.mrf.mxu1 }
 0x13d   : > { %v1883_v22 = vadd.f32 %v1203_v18, %v1840_v54  ;;  %v1886_v23 = vadd.f32 %v1251_v19, %v1840_v54 }
 0x13e   : > { %v1205_v24 = vpop.f32.mrf.mxu0  ;;  %v1253_v25 = vpop.f32.mrf.mxu1 }
 0x13f   : > { %763 = vst [vmem:[%s1856_s7 + $0x18] sm:$0xff] %v1883_v22  ;;  %779 = vst [vmem:[%s1856_s7 + $0x98] sm:$0xff] %v1886_v23  ;;  %v1206_v26 = vadd.f32 %v1205_v24, %v1204_v20  ;;  %v1254_v27 = vadd.f32 %v1253_v25, %v1252_v21 }
 0x140   : > { %v1207_v28 = vpop.f32.mrf.mxu0  ;;  %v1255_v29 = vpop.f32.mrf.mxu1 }
 0x141   : > { %v1893_v30 = vadd.f32 %v1206_v26, %v1840_v54  ;;  %v1896_v31 = vadd.f32 %v1254_v27, %v1840_v54 }
 0x142   : > { %v1208_v32 = vpop.f32.mrf.mxu0  ;;  %v1256_v33 = vpop.f32.mrf.mxu1 }
 0x143   : > { %764 = vst [vmem:[%s1856_s7 + $0x20] sm:$0xff] %v1893_v30  ;;  %780 = vst [vmem:[%s1856_s7 + $0xa0] sm:$0xff] %v1896_v31  ;;  %v1209_v34 = vadd.f32 %v1208_v32, %v1207_v28  ;;  %v1257_v35 = vadd.f32 %v1256_v33, %v1255_v29 }
 0x144   : > { %v1210_v36 = vpop.f32.mrf.mxu0  ;;  %v1258_v37 = vpop.f32.mrf.mxu1 }
 0x145   : > { %v1903_v38 = vadd.f32 %v1209_v34, %v1840_v54  ;;  %v1906_v39 = vadd.f32 %v1257_v35, %v1840_v54 }
 0x146   : > { %v1211_v40 = vpop.f32.mrf.mxu0  ;;  %v1259_v41 = vpop.f32.mrf.mxu1 }
 0x147   : > { %765 = vst [vmem:[%s1856_s7 + $0x28] sm:$0xff] %v1903_v38  ;;  %781 = vst [vmem:[%s1856_s7 + $0xa8] sm:$0xff] %v1906_v39  ;;  %v1212_v42 = vadd.f32 %v1211_v40, %v1210_v36  ;;  %v1260_v43 = vadd.f32 %v1259_v41, %v1258_v37 }
 0x148   : > { %v1213_v44 = vpop.f32.mrf.mxu0  ;;  %v1261_v45 = vpop.f32.mrf.mxu1 }
 0x149   : > { %v1913_v46 = vadd.f32 %v1212_v42, %v1840_v54  ;;  %v1916_v47 = vadd.f32 %v1260_v43, %v1840_v54 }
 0x14a   : > { %v1214_v50 = vpop.f32.mrf.mxu0  ;;  %v1262_v52 = vpop.f32.mrf.mxu1 }
 0x14b   : > { %766 = vst [vmem:[%s1856_s7 + $0x30] sm:$0xff] %v1913_v46  ;;  %782 = vst [vmem:[%s1856_s7 + $0xb0] sm:$0xff] %v1916_v47  ;;  %v1215_v53 = vadd.f32 %v1214_v50, %v1213_v44  ;;  %v1263_v55 = vadd.f32 %v1262_v52, %v1261_v45 }
 0x14c   : > { %v1216_v56 = vpop.f32.mrf.mxu0  ;;  %v1264_v57 = vpop.f32.mrf.mxu1 }
 0x14d   : > { %v1923_v58 = vadd.f32 %v1215_v53, %v1840_v54  ;;  %v1926_v59 = vadd.f32 %v1263_v55, %v1840_v54 }
 0x14e   : > { %v1217_v60 = vpop.f32.mrf.mxu0  ;;  %v1265_v0 = vpop.f32.mrf.mxu1 }
 0x14f   : > { %767 = vst [vmem:[%s1856_s7 + $0x38] sm:$0xff] %v1923_v58  ;;  %783 = vst [vmem:[%s1856_s7 + $0xb8] sm:$0xff] %v1926_v59  ;;  %v1218_v1 = vadd.f32 %v1217_v60, %v1216_v56  ;;  %v1266_v2 = vadd.f32 %v1265_v0, %v1264_v57 }
 0x150   : > { %v1219_v3 = vpop.f32.mrf.mxu0  ;;  %v1267_v4 = vpop.f32.mrf.mxu1 }
 0x151   : > { %v1933_v5 = vadd.f32 %v1218_v1, %v1840_v54  ;;  %v1936_v8 = vadd.f32 %v1266_v2, %v1840_v54 }
 0x152   : > { %v1220_v9 = vpop.f32.mrf.mxu0  ;;  %v1268_v10 = vpop.f32.mrf.mxu1 }
 0x153   : > { %768 = vst [vmem:[%s1856_s7 + $0x40] sm:$0xff] %v1933_v5  ;;  %784 = vst [vmem:[%s1856_s7 + $0xc0] sm:$0xff] %v1936_v8  ;;  %v1221_v11 = vadd.f32 %v1220_v9, %v1219_v3  ;;  %v1269_v12 = vadd.f32 %v1268_v10, %v1267_v4 }
 0x154   : > { %v1222_v13 = vpop.f32.mrf.mxu0  ;;  %v1270_v16 = vpop.f32.mrf.mxu1 }
 0x155   : > { %v1943_v17 = vadd.f32 %v1221_v11, %v1840_v54  ;;  %v1946_v18 = vadd.f32 %v1269_v12, %v1840_v54 }
 0x156   : > { %v1223_v19 = vpop.f32.mrf.mxu0  ;;  %v1271_v20 = vpop.f32.mrf.mxu1 }
 0x157   : > { %769 = vst [vmem:[%s1856_s7 + $0x48] sm:$0xff] %v1943_v17  ;;  %785 = vst [vmem:[%s1856_s7 + $0xc8] sm:$0xff] %v1946_v18  ;;  %v1224_v21 = vadd.f32 %v1223_v19, %v1222_v13  ;;  %v1272_v24 = vadd.f32 %v1271_v20, %v1270_v16  ;;  %v794_v16 = vsub.s32 1, %v1831_v49 }
 0x158   : > { %v1225_v25 = vpop.f32.mrf.mxu0  ;;  %v1273_v26 = vpop.f32.mrf.mxu1 }
 0x159   : > { %v1953_v27 = vadd.f32 %v1224_v21, %v1840_v54  ;;  %v1956_v28 = vadd.f32 %v1272_v24, %v1840_v54 }
 0x15a   : > { %v1226_v29 = vpop.f32.mrf.mxu0  ;;  %v1274_v32 = vpop.f32.mrf.mxu1 }
 0x15b   : > { %770 = vst [vmem:[%s1856_s7 + $0x50] sm:$0xff] %v1953_v27  ;;  %786 = vst [vmem:[%s1856_s7 + $0xd0] sm:$0xff] %v1956_v28  ;;  %v1227_v33 = vadd.f32 %v1226_v29, %v1225_v25  ;;  %v1275_v34 = vadd.f32 %v1274_v32, %v1273_v26  ;;  %v1986_v29 = vrot.slane %v1837_v51, %v794_v16 }
 0x15c   : > { %v1228_v35 = vpop.f32.mrf.mxu0  ;;  %v1276_v36 = vpop.f32.mrf.mxu1 }
 0x15d   : > { %v1963_v37 = vadd.f32 %v1227_v33, %v1840_v54  ;;  %v1966_v40 = vadd.f32 %v1275_v34, %v1840_v54 }
 0x15e   : > { %v1229_v41 = vpop.f32.mrf.mxu0  ;;  %v1277_v42 = vpop.f32.mrf.mxu1 }
 0x15f   : > { %771 = vst [vmem:[%s1856_s7 + $0x58] sm:$0xff] %v1963_v37  ;;  %787 = vst [vmem:[%s1856_s7 + $0xd8] sm:$0xff] %v1966_v40  ;;  %v1230_v43 = vadd.f32 %v1229_v41, %v1228_v35  ;;  %v1278_v44 = vadd.f32 %v1277_v42, %v1276_v36 }
 0x160   : > { %v1231_v45 = vpop.f32.mrf.mxu0  ;;  %v1279_v50 = vpop.f32.mrf.mxu1 }
 0x161   : > { %v682_v52 = vadd.f32 %v1230_v43, %v1840_v54  ;;  %v746_v53 = vadd.f32 %v1278_v44, %v1840_v54 }
 0x162   : > { %v1232_v55 = vpop.f32.mrf.mxu0  ;;  %v1280_v56 = vpop.f32.mrf.mxu1 }
 0x163   : > { %772 = vst [vmem:[%s1856_s7 + $0x60] sm:$0xff] %v682_v52  ;;  %788 = vst [vmem:[%s1856_s7 + $0xe0] sm:$0xff] %v746_v53  ;;  %v1233_v57 = vadd.f32 %v1232_v55, %v1231_v45  ;;  %v1281_v60 = vadd.f32 %v1280_v56, %v1279_v50  ;;  %v824_v55 = vsub.f32 %v746_v53, %v1986_v29 }
 0x164   : > { %v1234_v0 = vpop.f32.mrf.mxu0  ;;  %v1282_v1 = vpop.f32.mrf.mxu1  ;;  %v808_v56 = vsub.f32 %v682_v52, %v1986_v29  ;;  %v806_v52 = vsub.f32 %v1953_v27, %v1986_v29  ;;  %v804_v27 = vsub.f32 %v1933_v5, %v1986_v29  ;;  %v802_v5 = vsub.f32 %v1913_v46, %v1986_v29 }
 0x165   : > { %v685_v2 = vadd.f32 %v1233_v57, %v1840_v54  ;;  %v749_v3 = vadd.f32 %v1281_v60, %v1840_v54  ;;  %v857_v60 = vmul.f32 %v824_v55, %v824_v55  ;;  %v800_v46 = vsub.f32 %v1893_v30, %v1986_v29 }
 0x166   : > { %v1235_v4 = vpop.f32.mrf.mxu0  ;;  %v1283_v9 = vpop.f32.mrf.mxu1  ;;  %v837_v16 = vmul.f32 %v804_v27, %v804_v27  ;;  %v798_v30 = vsub.f32 %v1873_v14, %v1986_v29  ;;  %v796_v14 = vsub.f32 %v1848_v62, %v1986_v29 }
 0x167   : > { %773 = vst [vmem:[%s1856_s7 + $0x68] sm:$0xff] %v685_v2  ;;  %789 = vst [vmem:[%s1856_s7 + $0xe8] sm:$0xff] %v749_v3  ;;  %v1236_v10 = vadd.f32 %v1235_v4, %v1234_v0  ;;  %v1284_v11 = vadd.f32 %v1283_v9, %v1282_v1  ;;  %v825_v51 = vsub.f32 %v749_v3, %v1986_v29 }
 0x168   : > { %v1237_v12 = vpop.f32.mrf.mxu0  ;;  %v1285_v13 = vpop.f32.mrf.mxu1  ;;  %v823_v0 = vsub.f32 %v1966_v40, %v1986_v29  ;;  %v807_v1 = vsub.f32 %v1963_v37, %v1986_v29  ;;  %v841_v3 = vmul.f32 %v808_v56, %v808_v56  ;;  %v822_v4 = vsub.f32 %v1956_v28, %v1986_v29 }
 0x169   : > { %v690_v19 = vadd.f32 %v1236_v10, %v1840_v54  ;;  %v754_v20 = vadd.f32 %v1284_v11, %v1840_v54  ;;  %v858_v50 = vmul.f32 %v825_v51, %v825_v51  ;;  %v821_v40 = vsub.f32 %v1946_v18, %v1986_v29 }
 0x16a   : > { %v1238_v21 = vpop.f32.mrf.mxu0  ;;  %v1286_v24 = vpop.f32.mrf.mxu1  ;;  %v840_v53 = vmul.f32 %v807_v1, %v807_v1  ;;  %v855_v9 = vmul.f32 %v822_v4, %v822_v4  ;;  %v805_v37 = vsub.f32 %v1943_v17, %v1986_v29  ;;  %v839_v10 = vmul.f32 %v806_v52, %v806_v52 }
 0x16b   : > { %774 = vst [vmem:[%s1856_s7 + $0x70] sm:$0xff] %v690_v19  ;;  %790 = vst [vmem:[%s1856_s7 + $0xf0] sm:$0xff] %v754_v20  ;;  %v1239_v25 = vadd.f32 %v1238_v21, %v1237_v12  ;;  %v1287_v26 = vadd.f32 %v1286_v24, %v1285_v13  ;;  %v826_v36 = vsub.f32 %v754_v20, %v1986_v29 }
 0x16c   : > { %v810_v43 = vsub.f32 %v690_v19, %v1986_v29  ;;  %v854_v11 = vmul.f32 %v821_v40, %v821_v40  ;;  %v820_v28 = vsub.f32 %v1936_v8, %v1986_v29  ;;  %v838_v12 = vmul.f32 %v805_v37, %v805_v37 }
 0x16d   : > { %v693_v32 = vadd.f32 %v1239_v25, %v1840_v54  ;;  %v757_v33 = vadd.f32 %v1287_v26, %v1840_v54  ;;  %v859_v44 = vmul.f32 %v826_v36, %v826_v36  ;;  %v809_v54 = vsub.f32 %v685_v2, %v1986_v29 }
 0x16e   : > { %v843_v45 = vmul.f32 %v810_v43, %v810_v43  ;;  %v856_v2 = vmul.f32 %v823_v0, %v823_v0  ;;  %v853_v13 = vmul.f32 %v820_v28, %v820_v28  ;;  %v819_v18 = vsub.f32 %v1926_v59, %v1986_v29 }
 0x16f   : > { %775 = vst [vmem:[%s1856_s7 + $0x78] sm:$0xff] %v693_v32  ;;  %v811_v34 = vsub.f32 %v693_v32, %v1986_v29  ;;  %791 = vst [vmem:[%s1856_s7 + $0xf8] sm:$0xff] %v757_v33  ;;  %v827_v35 = vsub.f32 %v757_v33, %v1986_v29  ;;  %v842_v57 = vmul.f32 %v809_v54, %v809_v54 }
 0x170   : > { %v803_v17 = vsub.f32 %v1923_v58, %v1986_v29  ;;  %v852_v19 = vmul.f32 %v819_v18, %v819_v18  ;;  %v818_v8 = vsub.f32 %v1916_v47, %v1986_v29  ;;  %v817_v59 = vsub.f32 %v1906_v39, %v1986_v29 }
 0x171   : > { %v844_v41 = vmul.f32 %v811_v34, %v811_v34  ;;  %v860_v42 = vmul.f32 %v827_v35, %v827_v35  ;;  %v801_v58 = vsub.f32 %v1903_v38, %v1986_v29  ;;  %v835_v24 = vmul.f32 %v802_v5, %v802_v5 }
 0x172   : > { %v836_v20 = vmul.f32 %v803_v17, %v803_v17  ;;  %v851_v21 = vmul.f32 %v818_v8, %v818_v8  ;;  %v850_v25 = vmul.f32 %v817_v59, %v817_v59  ;;  %v816_v47 = vsub.f32 %v1896_v31, %v1986_v29 }
 0x173   : > { %1288 = vmatprep.subr.mxu1 %v860_v42  ;;  %v834_v26 = vmul.f32 %v801_v58, %v801_v58  ;;  %v815_v39 = vsub.f32 %v1886_v23, %v1986_v29  ;;  %v799_v38 = vsub.f32 %v1883_v22, %v1986_v29  ;;  %v833_v33 = vmul.f32 %v800_v46, %v800_v46 }
 0x174   : > { %1289 = vmatpush3.xpose.msra.mxu1 %v844_v41  ;;  %v849_v32 = vmul.f32 %v816_v47, %v816_v47  ;;  %v814_v31 = vsub.f32 %v1876_v15, %v1986_v29  ;;  %v813_v23 = vsub.f32 %v1866_v7, %v1986_v29  ;;  %v797_v22 = vsub.f32 %v1863_v6, %v1986_v29 }
 0x175   : > { %1290 = vmatprep.subr.mxu1 %v859_v44  ;;  %v848_v34 = vmul.f32 %v815_v39, %v815_v39  ;;  %v832_v35 = vmul.f32 %v799_v38, %v799_v38  ;;  %v831_v41 = vmul.f32 %v798_v30, %v798_v30  ;;  %v812_v15 = vsub.f32 %v1851_v63, %v1986_v29 }
 0x176   : > { %v847_v36 = vmul.f32 %v814_v31, %v814_v31  ;;  %v846_v42 = vmul.f32 %v813_v23, %v813_v23  ;;  %v830_v7 = vmul.f32 %v797_v22, %v797_v22  ;;  %v829_v44 = vmul.f32 %v796_v14, %v796_v14 }
 0x177   : > { %v845_v43 = vmul.f32 %v812_v15, %v812_v15 }
 0x178   : > { %1291 = vmatpush3.xpose.msra.mxu1 %v843_v45 }
 0x179   : > { %1292 = vmatprep.subr.mxu1 %v858_v50 }
 0x17c   : > { %1293 = vmatpush3.xpose.msra.mxu1 %v842_v57 }
 0x17d   : > { %1294 = vmatprep.subr.mxu1 %v857_v60 }
 0x180   : > { %1295 = vmatpush3.xpose.msra.mxu1 %v841_v3 }
 0x181   : > { %1296 = vmatprep.subr.mxu1 %v856_v2 }
 0x184   : > { %1297 = vmatpush3.xpose.msra.mxu1 %v840_v53 }
 0x185   : > { %1298 = vmatprep.subr.mxu1 %v855_v9 }
 0x188   : > { %1299 = vmatpush3.xpose.msra.mxu1 %v839_v10 }
 0x189   : > { %1300 = vmatprep.subr.mxu1 %v854_v11 }
 0x18c   : > { %1301 = vmatpush3.xpose.msra.mxu1 %v838_v12 }
 0x18d   : > { %1302 = vmatprep.subr.mxu1 %v853_v13 }
 0x190   : > { %1303 = vmatpush3.xpose.msra.mxu1 %v837_v16 }
 0x191   : > { %1304 = vmatprep.subr.mxu1 %v852_v19 }
 0x194   : > { %1305 = vmatpush3.xpose.msra.mxu1 %v836_v20 }
 0x195   : > { %1306 = vmatprep.subr.mxu1 %v851_v21 }
 0x198   : > { %1307 = vmatpush3.xpose.msra.mxu1 %v835_v24 }
 0x199   : > { %1308 = vmatprep.subr.mxu1 %v850_v25 }
 0x19c   : > { %1309 = vmatpush3.xpose.msra.mxu1 %v834_v26 }
 0x19d   : > { %1310 = vmatprep.subr.mxu1 %v849_v32 }
 0x1a0   : > { %1311 = vmatpush3.xpose.msra.mxu1 %v833_v33 }
 0x1a1   : > { %1312 = vmatprep.subr.mxu1 %v848_v34 }
 0x1a4   : > { %1313 = vmatpush3.xpose.msra.mxu1 %v832_v35 }
 0x1a5   : > { %1314 = vmatprep.subr.mxu1 %v847_v36 }
 0x1a8   : > { %1315 = vmatpush3.xpose.msra.mxu1 %v831_v41 }
 0x1a9   : > { %1316 = vmatprep.subr.mxu1 %v846_v42 }
 0x1ac   : > { %1317 = vmatpush3.xpose.msra.mxu1 %v830_v7 }
 0x1ad   : > { %1318 = vmatprep.subr.mxu1 %v845_v43 }
 0x1b0   : > { %1319 = vmatpush3.xpose.msra.mxu1 %v829_v44 }
 0x1b3   : > { %1321 = vmatmul.mubr.f32.vlgmr.msra.gmra.mxu1 %v1845_v61 }
 0x1b4   : > { %1538 = shalt.err (!%p1535_p0)
}
 0x1b5   : > { %s1539_s24 = scalar_lea.hbm %s2053_s27, 4096  ;;  %s1543_s6 = scalar_lea.hbm %s2123_s4, 8192 }
 0x1b6   : > { %p1540_p5 = scmp.ne.s32.totalorder %s2053_s27, %s1539_s24  ;;  %p1544_p4 = scmp.lt.s32.totalorder %s2053_s27, %s2123_s4 }
 0x1b7   : > { %p1545_p6 = scmp.lt.s32.totalorder %s1543_s6, %s1539_s24 }
 0x1b8   : > { %p1541_p9 = pnand %p1540_p5, %p2140_p11 }
 0x1b9   : > { %p1546_p8 = por %p1545_p6, %p1544_p4 }
 0x1ba   : > { %p1542_p1 = pneg %p1541_p9 }
 0x1bc   : > { %p1547_p3 = pnand %p1546_p8, %p1542_p1 }
 0x1be   : > { %1550 = shalt.err (!%p1547_p3)
}
 0x1bf   : > { %s1632_s15 = smov 128   ;;  %s1633_s23 = smov 8   ;;  %v1634_v61 = vmov 1966171168   ;;  %vm952_vm0 = vcmp.lt.s32.totalorder %v339_v48, 256 }
 0x1c0   : > { %1344 = dma.vmem_to_hbm [thread:$0]  (%p2140_p11), %s2056_s28, 4096, %s2053_s27, %s956_s9, %s1632_s15, %s1632_s15, %s1633_s23   ;;  %v936_v62 = vunpack.c.l.s4 %v1634_v61 }
 0x1c1   : > { %s1115_s10 = sshll.u32 %s1782_s11, 1  ;;  %s1175_s12 = sshll.u32 %s1687_s22, 5 }
 0x1c2   : > { %v937_v63 = vunpack.c.0.s8 %v936_v62  ;;  %s269_s16 = scalar_lea.vmem [#allocation8], %s1115_s10  ;;  %s989_s28 = scalar_lea.hbm %s2124_s5, %s1175_s12 }
 0x1c3   : > { %s991_s17 = sshll.u32 %s269_s16, 4  ;;  %s961_s9 = scalar_lea.sflag [#allocation9], %s1782_s11  ;;  %s992_s17 = int_to_ptr.vmem [resolvable:$true] %s991_s17 }
 0x1c4   : > { %v940_v29 = vsub.s32 %v937_v63, %v1831_v49  ;;  %s1551_s26 = scalar_lea.vmem %s992_s17, 32  ;;  %s1635_s29 = smov [#allocation8]  }
 0x1c5   : > { %p1552_p7 = scmp.ne.s32.totalorder %s992_s17, %s1551_s26  ;;  %s1555_s22 = sshll.u32 %s1635_s29, 4  ;;  %s1556_s22 = int_to_ptr.vmem [resolvable:$false] %s1555_s22 }
 0x1c6   : > { %s1557_s6 = scalar_lea.vmem %s1556_s22, 64  ;;  %p1558_p2 = scmp.lt.s32.totalorder %s992_s17, %s1556_s22 }
 0x1c7   : > { %p1553_p12 = pnand %p1552_p7, %p2140_p11  ;;  %p1559_p13 = scmp.lt.s32.totalorder %s1557_s6, %s1551_s26 }
 0x1c9   : > { %p1554_p10 = pneg %p1553_p12  ;;  %p1560_p0 = por %p1559_p13, %p1558_p2 }
 0x1cb   : > { %p1561_p5 = pnand %p1560_p0, %p1554_p10 }
 0x273   : > { %v927_v6 = vpop.f32.mrf.mxu1 }
 0x275   : > { %v929_v51 = vpop.f32.mrf.mxu1 }
 0x276   : > { %v934_v54 = vcombine.low %v927_v6, %v929_v51 }
 0x278   : > { %v941_v45 = vrot.slane %v934_v54, %v940_v29 }
 0x27a   : > { %v948_v50 = vrot.slane %v941_v45, %v940_v29 }
 0x27c   : > { %954 = vst.msk [vmem:[%s269_s16] sm:$0x3] %vm952_vm0, %v948_v50 }
 0x27d   : > { %1564 = shalt.err (!%p1561_p5)
}
 0x27e   : > { %s1565_s7 = scalar_lea.hbm %s989_s28, 32  ;;  %s1569_s15 = scalar_lea.hbm %s2124_s5, 64 }
 0x27f   : > { %p1566_p9 = scmp.ne.s32.totalorder %s989_s28, %s1565_s7  ;;  %p1570_p6 = scmp.lt.s32.totalorder %s989_s28, %s2124_s5 }
 0x280   : > { %p1571_p8 = scmp.lt.s32.totalorder %s1569_s15, %s1565_s7 }
 0x281   : > { %p1567_p1 = pnand %p1566_p9, %p2140_p11 }
 0x282   : > { %p1572_p3 = por %p1571_p8, %p1570_p6 }
 0x283   : > { %p1568_p4 = pneg %p1567_p1 }
 0x285   : > { %p1573_p7 = pnand %p1572_p3, %p1568_p4 }
 0x287   : > { %1576 = shalt.err (!%p1573_p7)
}
 0x288   : > { %1345 = dma.vmem_to_hbm [thread:$0]  (%p2140_p11), %s992_s17, 32, %s989_s28, %s961_s9  }
 0x289 PF: > { %s1003_s12 = sand.u32 1, %s1611_s18   ;;  %p2141_p12 = scmp.ne.s32.totalorder %s2130_s25, 0 }
 0x28a   : > { %p2142_p10 = scmp.ge.s32.totalorder %s1623_s21, 2  ;;  %s1004_s16 = scalar_lea.sflag [#allocation4], %s1003_s12 }
 0x28c   : > { %p1357_p2 = pnand %p2142_p10, %p2141_p12 }
 0x28e   : > { %p1358_p13 = pneg %p1357_p2 }
 0x290   : > { %1602 = dma.done.wait (%p1358_p13), %s1004_s16, 4096  }
 0x291   : > { %1604 = vsyncadd (%p1358_p13), %s1004_s16, 4294963200  ;;  %s1013_s24 = scalar_lea.sflag [#allocation9], %s1003_s12 }
 0x292   : > { %1606 = dma.done.wait (%p1358_p13), %s1013_s24, 32  }
 0x293   : > { %1608 = vsyncadd (%p1358_p13), %s1013_s24, 4294967264  ;;  %p23_p11 = scmp.ge.s32.totalorder %s1720_s30, 4   ;;  %s2143_s18 = smov %s1615_s19 }
 0x294   : > { %s2144_s19 = smov %s1619_s20  ;;  %s2145_s20 = smov %s1737_s13 }
 0x295   : > { %s2146_s21 = smov %s1720_s30  ;;  %25 = sbr.rel (!%p23_p11) target bundleno = 8 (0x8), region = 102 }
 0x29a   :  { %1018 = vsyncpa [#allocation3], 1 }
 0x29b   :  { %1020 = vsyncpa [#allocation3 + $0x1], 1 }
 0x29c   :  { %1021 = vsyncpa [#allocation6], 1 }
 0x29d   :  { %1022 = vsyncpa [#allocation4], 1 }
 0x29e   :  { %1024 = vsyncpa [#allocation4 + $0x1], 1 }
 0x29f   :  { %1025 = vsyncpa [#allocation9], 1 }
 0x2a0   :  { %1027 = vsyncpa [#allocation9 + $0x1], 1 }

</bundles_post_ra>
